<compile_context>
chip_gen: v5e
topology: v5e:2x2
jax: 0.10.0
libtpu: 0.0.40
codegen_flags: <defaults>
</compile_context>

<pallas_src>
import math
import functools

import jax
import jax.numpy as jnp
from jax.experimental import pallas as pl
from jax.experimental.pallas import tpu as pltpu


def _pos_enc_kernel(emb_ref, pe_ref, out_ref, *, scale):
    # emb_ref / pe_ref / out_ref: identically shaped (1, TR, C) VMEM tiles.
    # Straight VPU multiply-add, no in-kernel broadcast/reshape.
    x = emb_ref[...].astype(jnp.float32)
    p = pe_ref[...].astype(jnp.float32)
    out_ref[...] = (x * scale + p).astype(out_ref.dtype)


def make_sinusoidal_pe(max_len: int, dim: int) -> jnp.ndarray:
    """Deterministic construction of the pe buffer, identical to the PyTorch init."""
    assert dim % 2 == 0, "PositionalEncoding requires an even model dim"
    position = jnp.arange(max_len, dtype=jnp.float32)[:, None]           # (max_len, 1)
    div_term = jnp.exp(
        jnp.arange(0, dim, 2, dtype=jnp.float32) * -(math.log(10000.0) / dim)
    )                                                                    # (dim//2,)
    pe = jnp.zeros((max_len, dim), dtype=jnp.float32)
    pe = pe.at[:, 0::2].set(jnp.sin(position * div_term))
    pe = pe.at[:, 1::2].set(jnp.cos(position * div_term))
    return pe                                                            # (max_len, dim)


def _choose_fused_tiles(S, D, itemsize, target_block_bytes=2 * 1024 * 1024,
                        max_lanes=8192):
    """Split the fused S*D axis into (R, C) and pick a row tile TR.

    C: last (lane) dim, a multiple of 128 whenever possible (lane-dense stores).
    TR: divides R; multiple of the sublane quantum (8 f32 / 16 bf16) or equal to R;
        chosen as large as possible while TR*C*itemsize <= target_block_bytes.
    """
    F = S * D
    if F % 128 == 0:
        C = 128
        while C * 2 <= max_lanes and F % (C * 2) == 0:
            C *= 2
    else:
        # Odd/tiny shapes: single fused row, full-extent lane dim (still legal).
        C = F
    R = F // C

    sub_mult = {4: 8, 2: 16, 1: 32}.get(itemsize, 8)
    candidates = {R}
    t = sub_mult
    while t < R:
        if R % t == 0:
            candidates.add(t)
        t *= 2
    fitting = [c for c in candidates if c * C * itemsize <= target_block_bytes]
    TR = max(fitting) if fitting else min(candidates)
    return R, C, TR


def positional_encoding_forward(emb: jnp.ndarray, pe: jnp.ndarray, dim: int) -> jnp.ndarray:
    """emb: (B, S, D); pe: (max_len, D) float32. Returns (B, S, D)."""
    B, S, D = emb.shape
    assert D == dim
    scale = math.sqrt(dim)
    itemsize = jnp.dtype(emb.dtype).itemsize

    R, C, TR = _choose_fused_tiles(S, D, itemsize)
    block_bytes = TR * C * itemsize
    # 2x emb-in + 2x pe + 2x out double-buffers must fit the scoped-VMEM budget on
    # every generation (v7x has the smallest physical VMEM at 64 MiB).
    vmem_limit_bytes = 32 * 1024 * 1024
    assert 6 * block_bytes <= vmem_limit_bytes, (
        f"tile too large for VMEM: 6*{block_bytes} > {vmem_limit_bytes}")

    emb_f = emb.reshape(B, R, C)
    pe_f = pe[:S, :].reshape(1, R, C).astype(emb.dtype)   # shared slab, no batch bcast

    kernel = functools.partial(_pos_enc_kernel, scale=scale)

    out_f = pl.pallas_call(
        kernel,
        out_shape=jax.ShapeDtypeStruct((B, R, C), emb.dtype),
        grid_spec=pltpu.PrefetchScalarGridSpec(
            num_scalar_prefetch=0,
            grid=(R // TR, B),                 # fused-row tiles outer, batch inner
            in_specs=[
                pl.BlockSpec((1, TR, C), lambda r, b: (b, r, 0)),   # emb tile
                pl.BlockSpec((1, TR, C), lambda r, b: (0, r, 0)),   # pe tile (reused over b)
            ],
            out_specs=pl.BlockSpec((1, TR, C), lambda r, b: (b, r, 0)),
        ),
        compiler_params=pltpu.CompilerParams(
            dimension_semantics=("parallel", "parallel"),
            vmem_limit_bytes=vmem_limit_bytes,
        ),
    )(emb_f, pe_f)

    return out_f.reshape(B, S, D)


def _check(B, S, D, max_len, key):
    emb = jax.random.normal(key, (B, S, D), dtype=jnp.float32)
    pe = make_sinusoidal_pe(max_len, D)
    out = jax.block_until_ready(positional_encoding_forward(emb, pe, D))
    ref = emb * math.sqrt(D) + pe[None, :S, :]
    assert out.shape == (B, S, D)
    assert jnp.allclose(out, ref, atol=1e-5, rtol=1e-5)


if __name__ == "__main__":
    key = jax.random.PRNGKey(0)
    k0, k1, k2 = jax.random.split(key, 3)

    # Small shape consistent with the module (batch=2, seq=8, hidden=32).
    _check(B=2, S=8, D=32, max_len=5000, key=k0)
    # Larger shapes exercising lane-dense fused tiling and multi-tile row grid.
    _check(B=2, S=128, D=256, max_len=5000, key=k1)
    _check(B=2, S=2048, D=512, max_len=5000, key=k2)

    print("KERNEL_OK")
</pallas_src>

<mosaic_0001>
module attributes {stable_mosaic.version = 11 : i64} {
  func.func @_pos_enc_kernel(%arg0: i32, %arg1: i32, %arg2: memref<1x1x256xf32, #tpu.memory_space<vmem>>, %arg3: memref<1x1x256xf32, #tpu.memory_space<vmem>>, %arg4: memref<1x1x256xf32, #tpu.memory_space<vmem>>) attributes {dimension_semantics = [#tpu.dimension_semantics<parallel>, #tpu.dimension_semantics<parallel>], iteration_bounds = array<i64: 1, 2>, scalar_prefetch = 0 : i64, scratch_operands = 0 : i64, tpu.core_type = #tpu.core_type<tc>, window_params = [{transform_indices = @transform_0, window_bounds = array<i64: 1, 1, 256>}, {transform_indices = @transform_1, window_bounds = array<i64: 1, 1, 256>}, {transform_indices = @transform_2, window_bounds = array<i64: 1, 1, 256>}]} {
    %c0 = arith.constant 0 : index
    %c0_0 = arith.constant 0 : index
    %c0_1 = arith.constant 0 : index
    %0 = vector.load %arg2[%c0, %c0_0, %c0_1] : memref<1x1x256xf32, #tpu.memory_space<vmem>>, vector<1x1x256xf32>
    %c0_2 = arith.constant 0 : index
    %c0_3 = arith.constant 0 : index
    %c0_4 = arith.constant 0 : index
    %1 = vector.load %arg3[%c0_2, %c0_3, %c0_4] : memref<1x1x256xf32, #tpu.memory_space<vmem>>, vector<1x1x256xf32>
    %cst = arith.constant 5.65685415 : f32
    %2 = vector.broadcast %cst : f32 to vector<1x1x256xf32>
    %3 = arith.mulf %0, %2 : vector<1x1x256xf32>
    %4 = arith.addf %3, %1 : vector<1x1x256xf32>
    %c0_5 = arith.constant 0 : index
    %c0_6 = arith.constant 0 : index
    %c0_7 = arith.constant 0 : index
    %5 = vector.load %arg4[%c0_5, %c0_6, %c0_7] : memref<1x1x256xf32, #tpu.memory_space<vmem>>, vector<1x1x256xf32>
    tpu.vector_store %arg4[%c0_5, %c0_6, %c0_7], %4 {strides = array<i32>} : memref<1x1x256xf32, #tpu.memory_space<vmem>>, vector<1x1x256xf32>,
    return
  }
  func.func @transform_0(%arg0: i32, %arg1: i32) -> (i32, i32, i32) {
    %c0_i32 = arith.constant 0 : i32
    %c0_i32_0 = arith.constant 0 : i32
    return %arg1, %arg0, %c0_i32 : i32, i32, i32
  }
  func.func @transform_1(%arg0: i32, %arg1: i32) -> (i32, i32, i32) {
    %c0_i32 = arith.constant 0 : i32
    %c0_i32_0 = arith.constant 0 : i32
    %c0_i32_1 = arith.constant 0 : i32
    return %c0_i32, %arg0, %c0_i32_0 : i32, i32, i32
  }
  func.func @transform_2(%arg0: i32, %arg1: i32) -> (i32, i32, i32) {
    %c0_i32 = arith.constant 0 : i32
    %c0_i32_0 = arith.constant 0 : i32
    return %arg1, %arg0, %c0_i32 : i32, i32, i32
  }
}

</mosaic_0001>

<bundles_post_ra>
// kernel: tpu_custom_call.1
= control target key start
LH: loop header
LB: loop body
LE: loop exit
PB: predicated region body
PF: predicated region fallthrough
CT: control target
= control target key end

     0   :  { %7 = vsyncpa [#allocation3], 0  ;;  %s723_s0 = inlined_call_operand.hbm [shape: f32[2,1,256], index: 0, kind: input, shape index: {}]   ;;  %s724_s1 = inlined_call_operand.hbm [shape: f32[1,1,256], index: 1, kind: input, shape index: {}]   ;;  %s725_s2 = inlined_call_operand.hbm [shape: f32[2,1,256], index: 2, kind: output, shape index: {}]  }
   0x1   :  { %9 = vsyncpa [#allocation3 + $0x1], 0 }
   0x2   :  { %10 = vsyncpa [#allocation6], 0 }
   0x3   :  { %11 = vsyncpa [#allocation4], 0 }
   0x4   :  { %13 = vsyncpa [#allocation4 + $0x1], 0  ;;  %s574_s9 = smov 0   ;;  %s576_s10 = smov 0  }
   0x5   :  { %s578_s11 = smov 0   ;;  %s580_s12 = smov 0  }
   0x6   :  { %s582_s13 = smov 0   ;;  %s584_s14 = smov 0  }
   0x7 LB: > { %s322_s15 = sadd.s32 4294967295, %s556_s14   ;;  %s323_s16 = sadd.s32 4294967294, %s556_s14   ;;  %s556_s14 = sphi %s584_s14, %s19_s14   ;;  %s552_s13 = sphi %s582_s13, %s737_s13   ;;  %s548_s12 = sphi %s580_s12, %s736_s12   ;;  %s544_s11 = sphi %s578_s11, %s735_s11   ;;  %s540_s10 = sphi %s576_s10, %s734_s10   ;;  %s536_s9 = sphi %s574_s9, %s733_s9  }
   0x8   : > { %p53_p0 = scmp.ne.s32.totalorder %s540_s10, %s536_s9  ;;  %p608_p1 = scmp.eq.s32.totalorder %s322_s15, 0 }
   0x9   : > { %p612_p2 = scmp.eq.s32.totalorder %s322_s15, 1  ;;  %p111_p3 = scmp.eq.s32.totalorder %s323_s16, 1 }
   0xa   : > { %p618_p4 = por %p608_p1, %p53_p0  ;;  %p324_p5 = scmp.ge.s32.totalorder %s556_s14, 1 }
   0xb   : > { %p623_p6 = por %p111_p3, %p53_p0  ;;  %p118_p7 = scmp.lt.s32.totalorder %s556_s14, 3 }
   0xc   : > { %s132_s23 = sshll.u32 %s724_s1, 4  ;;  %p326_p9 = scmp.ge.s32.totalorder %s556_s14, 2  ;;  %s133_s23 = int_to_ptr.hbm [resolvable:$true] %s132_s23 }
   0xd   : > { %p631_p8 = pnand %p324_p5, %p118_p7  ;;  %s558_s25 = smov [#allocation5]  }
   0xe   : > { %s134_s26 = sshll.u32 %s558_s25, 4  ;;  %s28_s27 = sadd.s32 1, %s552_s13  ;;  %s135_s26 = int_to_ptr.vmem [resolvable:$true] %s134_s26 }
   0xf   : > { %p345_p10 = pneg %p631_p8  ;;  %p29_p12 = scmp.ge.s32.totalorder %s28_s27, 2 }
  0x10   : > { %s40_s28 = sadd.s32 1, %s544_s11  ;;  %p47_p13 = scmp.ne.s32.totalorder %s544_s11, %s540_s10 }
  0x11   : > { %p346_p11 = pnand %p345_p10, %p608_p1  ;;  %p48_p0 = scmp.eq.s32.totalorder %s556_s14, 0 }
  0x12   : > { %s739_s27 = smov (%p29_p12, %s28_s27), 0  ;;  %p653_p5 = por %p612_p2, %p47_p13 }
  0x13   : > { %348 = dma.hbm_to_vmem [thread:$0]  (!%p346_p11), %s133_s23, 32, %s135_s26, [#allocation6]  }
  0x14   : > { %p647_p3 = por %p48_p0, %p47_p13  ;;  %s35_s3 = ssub.s32 %s552_s13, %s739_s27 }
  0x15   : > { %p358_p7 = scmp.lt.s32.totalorder %s556_s14, 2  ;;  %p38_p10 = scmp.eq.s32.totalorder %s35_s3, 0 }
  0x16   : > { %s145_s4 = sand.u32 1, %s544_s11   ;;  %s328_s7 = sshll.u32 %s552_s13, 1 }
  0x17   : > { %s327_s5 = sshll.u32 %s145_s4, 1  ;;  %s155_s16 = scalar_lea.hbm %s723_s0, %s328_s7 }
  0x18   : > { %s662_s6 = scalar_select %p38_p10, %s544_s11, %s40_s28  }
  0x19   : > { %s149_s21 = scalar_lea.vmem [#allocation2], %s327_s5  ;;  %s157_s18 = sshll.u32 %s155_s16, 4  ;;  %s158_s18 = int_to_ptr.hbm [resolvable:$true] %s157_s18 }
  0x1a   : > { %s159_s22 = sshll.u32 %s149_s21, 4  ;;  %p350_p2 = pnand %p358_p7, %p647_p3  ;;  %s160_s22 = int_to_ptr.vmem [resolvable:$true] %s159_s22 }
  0x1b   : > { %s146_s23 = scalar_lea.sflag [#allocation3], %s145_s4  ;;  %168 = sbr.rel (%p631_p8) target bundleno = 50 (0x32), region = 28 }
  0x1c   : > { %352 = dma.hbm_to_vmem [thread:$0]  (!%p350_p2), %s158_s18, 32, %s160_s22, %s146_s23  }
  0x1d   : > { %s673_s25 = sand.u32 (!%p631_p8), 1, %s540_s10  }
  0x1e   : > { %s330_s26 = sshll.u32 (!%p631_p8), %s673_s25, 1  ;;  %s171_s28 = scalar_lea.sflag (!%p631_p8), [#allocation3], %s673_s25 }
  0x1f   : > { %s174_s3 = scalar_lea.vmem (!%p631_p8), [#allocation2], %s330_s26 }
  0x20   : > { %523 = dma.done.wait (%p618_p4), %s171_s28, 32  }
  0x21   : > { %525 = vsyncadd (%p618_p4), %s171_s28, 4294967264 }
  0x22   : > { %527 = dma.done.wait (%p608_p1), [#allocation6], 32  }
  0x23   : > { %529 = vsyncadd (%p608_p1), [#allocation6], 4294967264  ;;  %s334_s24 = sshll.u32 %s548_s12, 1  ;;  %v205_v0 = vlaneseq  ;;  %v201_v1 = vld [vmem:[%s174_s3] sm:$0x3]  ;;  %s200_s7 = scalar_lea.vmem [#allocation7], %s330_s26 }
  0x24   : > { %s223_s5 = scalar_lea.hbm %s725_s2, %s334_s24  ;;  %v202_v2 = vld [vmem:[#allocation5] sm:$0x3]  ;;  %s225_s19 = sshll.u32 %s200_s7, 4  ;;  %v203_v3 = vmul.f32 5.656854, %v201_v1  ;;  %s226_s19 = int_to_ptr.vmem [resolvable:$true] %s225_s19 }
  0x25   : > { %s227_s8 = sshll.u32 %s223_s5, 4  ;;  %vm207_vm0 = vcmp.lt.s32.totalorder %v205_v0, 256  ;;  %s211_s17 = scalar_lea.sflag [#allocation4], %s673_s25  ;;  %s228_s8 = int_to_ptr.hbm [resolvable:$true] %s227_s8 }
  0x26   : > { %v204_v4 = vadd.f32 %v203_v3, %v202_v2  ;;  %s484_s15 = sshra.s32 %s228_s8, 4  ;;  %s490_s22 = scalar_lea.hbm %s725_s2, 4  ;;  %s485_s15 = int_to_ptr.hbm [resolvable:$true] %s484_s15 }
  0x27   : > { %s486_s12 = scalar_lea.hbm %s485_s15, 2  ;;  %p491_p11 = scmp.lt.s32.totalorder %s485_s15, %s725_s2 }
  0x28   : > { %209 = vst.msk [vmem:[%s200_s7] sm:$0x3] %vm207_vm0, %v204_v4  ;;  %p487_p1 = scmp.ne.s32.totalorder %s485_s15, %s486_s12  ;;  %p492_p12 = scmp.lt.s32.totalorder %s490_s22, %s486_s12 }
  0x2a   : > { %p488_p4 = pnand %p487_p1, %p653_p5  ;;  %p493_p13 = por %p492_p12, %p491_p11 }
  0x2c   : > { %p489_p8 = pneg %p488_p4 }
  0x2e   : > { %p494_p0 = pnand %p493_p13, %p489_p8 }
  0x30   : > { %497 = shalt.err (!%p494_p0)
}
  0x31   : > { %343 = dma.vmem_to_hbm [thread:$0]  (%p653_p5), %s226_s19, 32, %s228_s8, %s211_s17  }
  0x32 PF: > { %s239_s25 = sand.u32 1, %s536_s9   ;;  %p354_p3 = pnand %p326_p9, %p623_p6 }
  0x33   : > { %s240_s26 = scalar_lea.sflag [#allocation4], %s239_s25 }
  0x34   : > { %p355_p7 = pneg %p354_p3 }
  0x36   : > { %531 = dma.done.wait (%p355_p7), %s240_s26, 32  }
  0x37   : > { %533 = vsyncadd (%p355_p7), %s240_s26, 4294967264  ;;  %s19_s14 = sadd.s32 1, %s556_s14   ;;  %s733_s9 = smov %s540_s10 }
  0x38   : > { %p16_p10 = scmp.ge.s32.totalorder %s19_s14, 4   ;;  %s734_s10 = smov %s544_s11 }
  0x39   : > { %s735_s11 = smov %s662_s6  ;;  %s736_s12 = smov %s552_s13 }
  0x3a   : > { %s737_s13 = smov %s739_s27  ;;  %18 = sbr.rel (!%p16_p10) target bundleno = 7 (0x7), region = 78 }
  0x3f   :  { %246 = vsyncpa [#allocation3], 1 }
  0x40   :  { %248 = vsyncpa [#allocation3 + $0x1], 1 }
  0x41   :  { %249 = vsyncpa [#allocation6], 1 }
  0x42   :  { %250 = vsyncpa [#allocation4], 1 }
  0x43   :  { %252 = vsyncpa [#allocation4 + $0x1], 1 }

</bundles_post_ra>
